<compile_context>
chip_gen: v7x
topology: tpu7x:2x2x1
jax: 0.10.0
libtpu: 0.0.40
codegen_flags: <defaults>
</compile_context>

<pallas_src>
import math

import jax
import jax.numpy as jnp
from jax.experimental import pallas as pl
from jax.experimental.pallas import tpu as pltpu

_EPS = 1e-16
_TARGET_BLOCK_BYTES = 2 << 20  # ~2 MiB per input block (x2 for double-buffering)


# ---------------- kernels ----------------

def _entropy_map_kernel(x_ref, o_ref):
    # x_ref: (1, C, TR, 128) tile; o_ref: (1, TR, 128) dense entropy-map tile.
    x = x_ref[...].astype(jnp.float32)
    # Channel axis is NOT a vreg axis -> this is C elementwise VPU adds.
    o_ref[...] = -jnp.sum(x * jnp.log(x + _EPS), axis=1)


def _entropy_partial_kernel(x_ref, o_ref):
    # x_ref: (1, C, TR, 128) tile; o_ref: (1, 1, 8, 128) per-tile partial sums.
    x = x_ref[...].astype(jnp.float32)
    e = -jnp.sum(x * jnp.log(x + _EPS), axis=1)          # (1, TR, 128)
    tr = e.shape[1]
    # Fold TR sublane-rows down to one (8,128) slab with elementwise VPU adds;
    # the final cross-lane/sublane reduce happens once, outside the kernel.
    acc = jnp.sum(e.reshape(tr // 8, 8, 128), axis=0)    # (8, 128)
    o_ref[...] = acc.reshape(1, 1, 8, 128)


# ---------------- tiling helpers ----------------

def _cdiv(a, b):
    return -(-a // b)


def _round_up(v, m):
    return ((v + m - 1) // m) * m


def _choose_tiling(n, c):
    """Pick (TR, num_tiles, R_total) so blocks are (1, C, TR, 128), ~2 MiB."""
    r_full = _cdiv(max(n, 1), 128)       # 128-lane rows needed for n positions
    r8 = _round_up(r_full, 8)            # sublane-aligned row count
    bytes_per_row = c * 128 * 4          # f32 block bytes per sublane row
    tr_cap = max(8, (_TARGET_BLOCK_BYTES // bytes_per_row) // 8 * 8)
    num_tiles = _cdiv(r8, tr_cap)        # balance tiles to minimize padding
    tr = _round_up(_cdiv(r8, num_tiles), 8)
    r_total = num_tiles * tr
    return tr, num_tiles, r_total


# ---------------- wrapper ----------------

def entropy(x, reduction="mean"):
    """Pallas implementation of Entropy.forward for (B, C, *S) simplex inputs."""
    assert reduction in ("mean", "sum", "none")
    assert x.ndim >= 2
    b, c, *s = x.shape
    n = int(math.prod(s)) if s else 1

    tr, num_tiles, r_total = _choose_tiling(n, c)
    n_pad = r_total * 128

    # Free reshape (no transpose): positions flattened onto the trailing axes.
    x3 = x.reshape(b, c, n)
    if n_pad != n:
        # Zero padding contributes exactly 0 entropy: 0 * log(0 + eps) == 0.
        x3 = jnp.pad(x3, ((0, 0), (0, 0), (0, n_pad - n)))
    x4 = x3.reshape(b, c, r_total, 128)

    in_spec = pl.BlockSpec((1, c, tr, 128), lambda bi, ti: (bi, 0, ti, 0))
    grid = (b, num_tiles)

    if reduction == "none":
        out = pl.pallas_call(
            _entropy_map_kernel,
            out_shape=jax.ShapeDtypeStruct((b, r_total, 128), jnp.float32),
            grid_spec=pltpu.PrefetchScalarGridSpec(
                num_scalar_prefetch=0,
                grid=grid,
                in_specs=[in_spec],
                out_specs=pl.BlockSpec((1, tr, 128), lambda bi, ti: (bi, ti, 0)),
            ),
            compiler_params=pltpu.CompilerParams(
                dimension_semantics=("parallel", "parallel")),
        )(x4)
        e = out.reshape(b, n_pad)[:, :n]
        return e.reshape(b, *s) if s else e.reshape(b)

    # 'mean' / 'sum': independent per-tile partial sums (parallel grid),
    # then a tiny final reduction in plain JAX.
    partials = pl.pallas_call(
        _entropy_partial_kernel,
        out_shape=jax.ShapeDtypeStruct((b, num_tiles, 8, 128), jnp.float32),
        grid_spec=pltpu.PrefetchScalarGridSpec(
            num_scalar_prefetch=0,
            grid=grid,
            in_specs=[in_spec],
            out_specs=pl.BlockSpec((1, 1, 8, 128), lambda bi, ti: (bi, ti, 0, 0)),
        ),
        compiler_params=pltpu.CompilerParams(
            dimension_semantics=("parallel", "parallel")),
    )(x4)
    total = jnp.sum(partials)
    if reduction == "mean":
        total = total / jnp.float32(b * n)
    return total


# ---------------- reference (pure JAX) ----------------

def entropy_ref(x, reduction="mean"):
    xf = x.astype(jnp.float32)
    e = -jnp.sum(xf * jnp.log(xf + _EPS), axis=1)
    if reduction == "mean":
        return jnp.mean(e)
    if reduction == "sum":
        return jnp.sum(e)
    return e


if __name__ == "__main__":
    key = jax.random.PRNGKey(0)
    B, C, H, W = 2, 4, 16, 16
    logits = jax.random.normal(key, (B, C, H, W), dtype=jnp.float32)
    x = jax.nn.softmax(logits, axis=1)  # simplex over channel dim, as the module asserts
    # TODO(synk): the module's `simplex(input_)` runtime assertion is not replicated.

    ok = True
    for red in ("mean", "sum", "none"):
        got = jax.block_until_ready(entropy(x, reduction=red))
        want = entropy_ref(x, reduction=red)
        if not jnp.allclose(got, want, rtol=1e-5, atol=1e-5):
            ok = False
            print(f"MISMATCH for reduction={red}")

    if ok:
        print("KERNEL_OK")
</pallas_src>

<mosaic_0001>
module attributes {stable_mosaic.version = 11 : i64} {
  func.func @_entropy_partial_kernel(%arg0: i32, %arg1: i32, %arg2: memref<1x4x8x128xf32, #tpu.memory_space<vmem>>, %arg3: memref<1x1x8x128xf32, #tpu.memory_space<vmem>>) attributes {dimension_semantics = [#tpu.dimension_semantics<parallel>, #tpu.dimension_semantics<parallel>], iteration_bounds = array<i64: 2, 1>, scalar_prefetch = 0 : i64, scratch_operands = 0 : i64, tpu.core_type = #tpu.core_type<tc>, window_params = [{transform_indices = @transform_0, window_bounds = array<i64: 1, 4, 8, 128>}, {transform_indices = @transform_1, window_bounds = array<i64: 1, 1, 8, 128>}]} {
    %c0 = arith.constant 0 : index
    %c0_0 = arith.constant 0 : index
    %c0_1 = arith.constant 0 : index
    %c0_2 = arith.constant 0 : index
    %0 = vector.load %arg2[%c0, %c0_0, %c0_1, %c0_2] : memref<1x4x8x128xf32, #tpu.memory_space<vmem>>, vector<1x4x8x128xf32>
    %cst = arith.constant 1.000000e-16 : f32
    %1 = vector.broadcast %cst : f32 to vector<1x4x8x128xf32>
    %2 = arith.addf %0, %1 : vector<1x4x8x128xf32>
    %3 = math.log %2 : vector<1x4x8x128xf32>
    %4 = arith.mulf %0, %3 : vector<1x4x8x128xf32>
    %cst_3 = arith.constant dense<0.000000e+00> : vector<1x8x128xf32>
    %5 = vector.multi_reduction <add>, %4, %cst_3 [1] : vector<1x4x8x128xf32> to vector<1x8x128xf32>
    %cst_4 = arith.constant 0.000000e+00 : f32
    %6 = vector.broadcast %cst_4 : f32 to vector<1x8x128xf32>
    %7 = arith.subf %6, %5 : vector<1x8x128xf32>
    %cst_5 = arith.constant dense<0.000000e+00> : vector<8x128xf32>
    %8 = vector.multi_reduction <add>, %7, %cst_5 [0] : vector<1x8x128xf32> to vector<8x128xf32>
    %9 = vector.shape_cast %8 : vector<8x128xf32> to vector<1x1x8x128xf32>
    %c0_6 = arith.constant 0 : index
    %c0_7 = arith.constant 0 : index
    %c0_8 = arith.constant 0 : index
    %c0_9 = arith.constant 0 : index
    %10 = vector.load %arg3[%c0_6, %c0_7, %c0_8, %c0_9] : memref<1x1x8x128xf32, #tpu.memory_space<vmem>>, vector<1x1x8x128xf32>
    tpu.vector_store %arg3[%c0_6, %c0_7, %c0_8, %c0_9], %9 {strides = array<i32>} : memref<1x1x8x128xf32, #tpu.memory_space<vmem>>, vector<1x1x8x128xf32>,
    return
  }
  func.func @transform_0(%arg0: i32, %arg1: i32) -> (i32, i32, i32, i32) {
    %c0_i32 = arith.constant 0 : i32
    %c0_i32_0 = arith.constant 0 : i32
    %c0_i32_1 = arith.constant 0 : i32
    return %arg0, %c0_i32, %arg1, %c0_i32_0 : i32, i32, i32, i32
  }
  func.func @transform_1(%arg0: i32, %arg1: i32) -> (i32, i32, i32, i32) {
    %c0_i32 = arith.constant 0 : i32
    %c0_i32_0 = arith.constant 0 : i32
    %c0_i32_1 = arith.constant 0 : i32
    return %arg0, %arg1, %c0_i32, %c0_i32_0 : i32, i32, i32, i32
  }
}

</mosaic_0001>

<bundles_post_ra>
// kernel: tpu_custom_call.1
= control target key start
LH: loop header
LB: loop body
LE: loop exit
PB: predicated region body
PF: predicated region fallthrough
CT: control target
= control target key end

     0   :  { %6 = vsyncpa [#allocation3], 0  ;;  %s663_s0 = inlined_call_operand.hbm [shape: f32[2,4,8,128], index: 0, kind: input, shape index: {}]   ;;  %s664_s1 = inlined_call_operand.hbm [shape: f32[2,1,8,128], index: 1, kind: output, shape index: {}]  }
   0x1   :  { %8 = vsyncpa [#allocation3 + $0x1], 0 }
   0x2   :  { %9 = vsyncpa [#allocation4], 0 }
   0x3   :  { %11 = vsyncpa [#allocation4 + $0x1], 0  ;;  %s489_s6 = smov 0   ;;  %s491_s7 = smov 0  }
   0x4   :  { %s493_s8 = smov 0   ;;  %s495_s9 = smov 0  }
   0x5   :  { %s497_s10 = smov 0   ;;  %s499_s11 = smov 0  }
   0x6 LB: > { %s274_s12 = sadd.s32 4294967295, %s473_s11   ;;  %s275_s13 = sadd.s32 4294967294, %s473_s11   ;;  %s473_s11 = sphi %s499_s11, %s17_s11   ;;  %s469_s10 = sphi %s497_s10, %s679_s10   ;;  %s465_s9 = sphi %s495_s9, %s678_s9   ;;  %s461_s8 = sphi %s493_s8, %s677_s8   ;;  %s457_s7 = sphi %s491_s7, %s676_s7   ;;  %s453_s6 = sphi %s489_s6, %s675_s6  }
   0x7   : > { %s29_s14 = sadd.s32 1, %s469_s10  ;;  %s38_s15 = sadd.s32 1, %s461_s8 }
   0x8   : > { %p31_p0 = scmp.ge.s32.totalorder %s29_s14, 2  ;;  %p45_p1 = scmp.ne.s32.totalorder %s461_s8, %s457_s7 }
   0x9   : > { %p46_p2 = scmp.eq.s32.totalorder %s473_s11, 0  ;;  %p51_p3 = scmp.ne.s32.totalorder %s457_s7, %s453_s6 }
   0xa   : > { %s681_s14 = smov (%p31_p0, %s29_s14), 0  ;;  %p52_p5 = scmp.eq.s32.totalorder %s274_s12, 0 }
   0xb   : > { %p530_p4 = por %p46_p2, %p45_p1  ;;  %s33_s17 = ssub.s32 %s469_s10, %s681_s14 }
   0xc   : > { %p77_p6 = scmp.eq.s32.totalorder %s274_s12, 1  ;;  %p36_p7 = scmp.eq.s32.totalorder %s33_s17, 0 }
   0xd   : > { %p536_p8 = por %p52_p5, %p51_p3  ;;  %p83_p10 = scmp.eq.s32.totalorder %s275_s13, 1 }
   0xe   : > { %p540_p9 = por %p77_p6, %p45_p1  ;;  %p301_p13 = scmp.lt.s32.totalorder %s473_s11, 2 }
   0xf   : > { %s545_s20 = scalar_select %p36_p7, %s461_s8, %s38_s15  }
  0x10   : > { %s668_s19 = scalar_select %p540_p9, 1, 0 }
  0x11   : > { %p547_p11 = por %p83_p10, %p51_p3  ;;  %s103_s22 = sand.u32 1, %s461_s8  }
  0x12   : > { %s278_s23 = sshll.u32 %s103_s22, 5  ;;  %s288_s24 = sshll.u32 %s469_s10, 9 }
  0x13   : > { %s669_s21 = scalar_select %p547_p11, 1, 0 }
  0x14   : > { %s558_s27 = scalar_lea.hbm %s663_s0, %s288_s24  ;;  %s107_s28 = scalar_lea.vmem [#allocation2], %s278_s23 }
  0x15   : > { %s115_s29 = sshll.u32 %s107_s28, 4  ;;  %p564_p0 = pnand %p301_p13, %p530_p4  ;;  %s560_s29 = int_to_ptr.vmem [resolvable:$true] %s115_s29 }
  0x16   : > { %s569_s2 = scalar_lea.sflag [#allocation3], %s103_s22  ;;  %s361_s3 = scalar_lea.hbm %s558_s27, 512 }
  0x17   : > { %p362_p2 = scmp.ne.s32.totalorder %s558_s27, %s361_s3  ;;  %p363_p3 = pneg %p564_p0 }
  0x18   : > { %s366_s12 = scalar_lea.hbm %s663_s0, 1024  ;;  %p367_p4 = scmp.lt.u32.totalorder %s558_s27, %s663_s0 }
  0x19   : > { %p364_p5 = pnand %p363_p3, %p362_p2  ;;  %p368_p7 = scmp.lt.u32.totalorder %s366_s12, %s361_s3 }
  0x1a   : > { %p370_p13 = scmp.lt.u32.totalorder %s361_s3, %s558_s27 }
  0x1b   : > { %p365_p6 = pneg %p364_p5  ;;  %p369_p10 = por %p368_p7, %p367_p4 }
  0x1d   : > { %p371_p12 = por %p370_p13, %p369_p10 }
  0x1f   : > { %p372_p1 = pnand %p371_p12, %p365_p6 }
  0x21   : > { %375 = shalt.err (!%p372_p1)
}
  0x22   : > { %s376_s16 = scalar_lea.vmem %s560_s29, 512  ;;  %s475_s17 = smov [#allocation2]  }
  0x23   : > { %p377_p2 = scmp.ne.s32.totalorder %s560_s29, %s376_s16  ;;  %s381_s22 = sshll.u32 %s475_s17, 4  ;;  %s382_s22 = int_to_ptr.vmem [resolvable:$false] %s381_s22 }
  0x24   : > { %s383_s23 = scalar_lea.vmem %s382_s22, 1024  ;;  %p384_p9 = scmp.lt.s32.totalorder %s560_s29, %s382_s22 }
  0x25   : > { %p379_p5 = pnand %p377_p2, %p363_p3  ;;  %p385_p4 = scmp.lt.s32.totalorder %s383_s23, %s376_s16 }
  0x27   : > { %p380_p11 = pneg %p379_p5  ;;  %p386_p7 = por %p385_p4, %p384_p9 }
  0x29   : > { %p387_p10 = pnand %p386_p7, %p380_p11 }
  0x2b   : > { %390 = shalt.err (!%p387_p10)
}
  0x2c   : > { %s476_s24 = smov 128   ;;  %s477_s25 = smov 8  }
  0x2d   : > { %296 = dma.hbm_to_vmem [thread:$0]  (!%p564_p0), %s558_s27, 512, %s560_s29, %s569_s2, %s476_s24, %s476_s24, %s477_s25  }
  0x2e   : > { %p123_p12 = scmp.lt.s32.totalorder %s473_s11, 3  ;;  %p671_p1 = scmp.ge.s32.totalorder %s473_s11, 1 }
  0x30   : > { %p124_p3 = pnand %p671_p1, %p123_p12 }
  0x31   : > { %s601_s26 = sand.u32 (!%p124_p3), 1, %s457_s7  }
  0x32   : > { %127 = sbr.rel (%p124_p3) target bundleno = 99 (0x63), region = 24  ;;  %s282_s28 = sshll.u32 (!%p124_p3), %s601_s26, 5 }
  0x33   : > { %s130_s3 = scalar_lea.sflag (!%p124_p3), [#allocation3], %s601_s26  ;;  %s133_s4 = scalar_lea.vmem (!%p124_p3), [#allocation2], %s282_s28 }
  0x39   : > { %444 = dma.done.wait (%p536_p8), %s130_s3, 512  }
  0x3a   : > { %446 = vsyncadd (%p536_p8), %s130_s3, 4294966784  ;;  %v152_v0 = vld [vmem:[%s133_s4] sm:$0xff]  ;;  %v153_v1 = vld [vmem:[%s133_s4 + $0x8] sm:$0xff]  ;;  %s283_s18 = sshll.u32 %s601_s26, 3  ;;  %s285_s30 = sshll.u32 %s465_s9, 7 }
  0x3b   : > { %v154_v2 = vld [vmem:[%s133_s4 + $0x10] sm:$0xff]  ;;  %v155_v3 = vld [vmem:[%s133_s4 + $0x18] sm:$0xff]  ;;  %v156_v4 = vadd.f32 1e-16, %v152_v0  ;;  %v157_v5 = vadd.f32 1e-16, %v153_v1  ;;  %s616_s12 = scalar_lea.hbm %s664_s1, %s285_s30 }
  0x3c   : > { %v158_v6 = vadd.f32 1e-16, %v154_v2  ;;  %v159_v7 = vadd.f32 1e-16, %v155_v3  ;;  %s151_s27 = scalar_lea.vmem [#allocation5], %s283_s18  ;;  %s179_s13 = scalar_lea.sflag [#allocation4], %s601_s26 }
  0x3d   : > { %353 = vlog2.f32 %v156_v4  ;;  %s193_s29 = sshll.u32 %s151_s27, 4  ;;  %p672_p9 = scmp.ne.s32.totalorder %s668_s19, 0  ;;  %s611_s29 = int_to_ptr.vmem [resolvable:$true] %s193_s29 }
  0x3e   : > { %355 = vlog2.f32 %v157_v5  ;;  %s391_s15 = scalar_lea.vmem %s611_s29, 128  ;;  %s478_s9 = smov [#allocation5]  }
  0x3f   : > { %357 = vlog2.f32 %v158_v6  ;;  %p392_p8 = scmp.ne.s32.totalorder %s611_s29, %s391_s15  ;;  %s395_s16 = sshll.u32 %s478_s9, 4  ;;  %s396_s16 = int_to_ptr.vmem [resolvable:$false] %s395_s16 }
  0x40   : > { %359 = vlog2.f32 %v159_v7  ;;  %s397_s17 = scalar_lea.vmem %s396_s16, 256  ;;  %p398_p6 = scmp.lt.s32.totalorder %s611_s29, %s396_s16 }
  0x41   : > { %p393_p11 = pnand %p392_p8, %p672_p9  ;;  %p399_p13 = scmp.lt.s32.totalorder %s397_s17, %s391_s15 }
  0x43   : > { %p394_p0 = pneg %p393_p11  ;;  %p400_p2 = por %p399_p13, %p398_p6 }
  0x45   : > { %p401_p5 = pnand %p400_p2, %p394_p0 }
  0x47   : > { %v354_v8 = vpop.eup %353 }
  0x48   : > { %v356_v9 = vpop.eup %355  ;;  %v161_v10 = vmul.f32 0.6931472, %v354_v8 }
  0x49   : > { %v358_v11 = vpop.eup %357  ;;  %v163_v12 = vmul.f32 0.6931472, %v356_v9 }
  0x4a   : > { %v360_v13 = vpop.eup %359  ;;  %v165_v14 = vmul.f32 0.6931472, %v358_v11  ;;  %v168_v15 = vmul.f32 %v161_v10, %v152_v0 }
  0x4b   : > { %v167_v16 = vmul.f32 0.6931472, %v360_v13  ;;  %v169_v17 = vmul.f32 %v163_v12, %v153_v1 }
  0x4c   : > { %v170_v18 = vmul.f32 %v165_v14, %v154_v2 }
  0x4d   : > { %v171_v19 = vmul.f32 %v167_v16, %v155_v3  ;;  %v172_v20 = vadd.f32 %v169_v17, %v168_v15 }
  0x4f   : > { %v173_v21 = vadd.f32 %v172_v20, %v170_v18 }
  0x51   : > { %v174_v22 = vadd.f32 %v173_v21, %v171_v19 }
  0x53   : > { %v175_v23 = vsub.f32 0.0, %v174_v22 }
  0x55   : > { %177 = vst [vmem:[%s151_s27] sm:$0xff] %v175_v23 }
  0x56   : > { %404 = shalt.err (!%p401_p5)
}
  0x57   : > { %s405_s22 = scalar_lea.hbm %s616_s12, 128  ;;  %s409_s25 = scalar_lea.hbm %s664_s1, 256 }
  0x58   : > { %p406_p4 = scmp.ne.s32.totalorder %s616_s12, %s405_s22  ;;  %p410_p12 = scmp.lt.u32.totalorder %s616_s12, %s664_s1 }
  0x59   : > { %p411_p1 = scmp.lt.u32.totalorder %s409_s25, %s405_s22  ;;  %p413_p8 = scmp.lt.u32.totalorder %s405_s22, %s616_s12 }
  0x5a   : > { %p407_p7 = pnand %p406_p4, %p672_p9 }
  0x5b   : > { %p412_p3 = por %p411_p1, %p410_p12 }
  0x5c   : > { %p408_p10 = pneg %p407_p7 }
  0x5d   : > { %p414_p11 = por %p413_p8, %p412_p3 }
  0x5f   : > { %p415_p0 = pnand %p414_p11, %p408_p10 }
  0x61   : > { %418 = shalt.err (!%p415_p0)
}
  0x62   : > { %291 = dma.vmem_to_hbm [thread:$0]  (%p672_p9), %s611_s29, 128, %s616_s12, %s179_s13  }
  0x63 PF: > { %s205_s3 = sand.u32 1, %s453_s6   ;;  %p673_p6 = scmp.ne.s32.totalorder %s669_s21, 0 }
  0x64   : > { %p674_p13 = scmp.ge.s32.totalorder %s473_s11, 2  ;;  %s206_s4 = scalar_lea.sflag [#allocation4], %s205_s3 }
  0x66   : > { %p298_p2 = pnand %p674_p13, %p673_p6 }
  0x68   : > { %448 = dma.done.wait (!%p298_p2), %s206_s4, 128  }
  0x69   : > { %450 = vsyncadd (!%p298_p2), %s206_s4, 4294967168  ;;  %s17_s11 = sadd.s32 1, %s473_s11   ;;  %s675_s6 = smov %s457_s7 }
  0x6a   : > { %p14_p5 = scmp.ge.s32.totalorder %s17_s11, 4   ;;  %s676_s7 = smov %s461_s8 }
  0x6b   : > { %s677_s8 = smov %s545_s20  ;;  %s678_s9 = smov %s469_s10 }
  0x6c   : > { %s679_s10 = smov %s681_s14  ;;  %16 = sbr.rel (!%p14_p5) target bundleno = 6 (0x6), region = 69 }
  0x73   :  { %211 = vsyncpa [#allocation3], 1 }
  0x74   :  { %213 = vsyncpa [#allocation3 + $0x1], 1 }
  0x75   :  { %214 = vsyncpa [#allocation4], 1 }
  0x76   :  { %216 = vsyncpa [#allocation4 + $0x1], 1 }

</bundles_post_ra>
